<compile_context>
chip_gen: v6e
topology: v6e:2x2x1
jax: 0.10.0
libtpu: 0.0.40
codegen_flags: <defaults>
</compile_context>

<pallas_src>
import math
import functools

import jax
import jax.numpy as jnp
from jax.experimental import pallas as pl
from jax.experimental.pallas import tpu as pltpu


def _round_up(v, m):
    return ((v + m - 1) // m) * m


def _pick_tile(total, want):
    """Largest multiple of 128 that divides `total` and is <= want (>=128)."""
    best = 128
    for cand in range(128, min(want, total) + 1, 128):
        if total % cand == 0:
            best = cand
    return best


def mlp_block_kernel(x_ref, g_ref, w1_ref, b1_ref, w2_ref, b2_ref,
                     o_ref, acc_ref, xn_ref, *, eps, true_e):
    j = pl.program_id(1)

    # ---- first hidden chunk: RMSNorm once per row tile, zero the accumulator ----
    @pl.when(j == 0)
    def _():
        x = x_ref[...].astype(jnp.float32)                       # (tm, Ep)
        g = g_ref[...].astype(jnp.float32)                       # (1, Ep)
        # mean over the *true* E (padded lanes are zero, so the sum is exact)
        ms = jnp.sum(x * x, axis=-1, keepdims=True) * (1.0 / true_e)
        xn = g * x * jax.lax.rsqrt(ms + eps)
        xn_ref[...] = xn.astype(xn_ref.dtype)                    # cached bf16 MXU operand
        acc_ref[...] = jnp.zeros_like(acc_ref)

    # ---- fc1 chunk + exact GELU (nn.GELU() default = erf formulation) ----
    h = jnp.dot(xn_ref[...], w1_ref[...],
                preferred_element_type=jnp.float32)              # (tm, tn) f32
    h = h + b1_ref[...].astype(jnp.float32)
    h = 0.5 * h * (1.0 + jax.lax.erf(h * (1.0 / math.sqrt(2.0))))

    # (dropout: identity in eval mode)
    # TODO(synk): training-mode dropout masking not emitted.

    # ---- fc2 chunk, accumulate in f32 ----
    acc_ref[...] += jnp.dot(h.astype(w2_ref.dtype), w2_ref[...],
                            preferred_element_type=jnp.float32)  # (tm, Ep)

    # ---- last hidden chunk: add fc2 bias, store ----
    @pl.when(j == pl.num_programs(1) - 1)
    def _():
        o_ref[...] = (acc_ref[...] + b2_ref[...].astype(jnp.float32)
                      ).astype(o_ref.dtype)


def mlp_block(x, gamma, w1, b1, w2, b2, *, eps=1e-6, tm=256, tn=512,
              compute_dtype=jnp.bfloat16):
    """x: (batch, seq, E). w1: (E, M), w2: (M, E). Returns (batch, seq, E)."""
    B, S, E = x.shape
    Ein, M = w1.shape
    assert Ein == E and w2.shape == (M, E)
    N = B * S

    # Lane-dense padding (multiples of 128 on the lane axis).
    E_pad = _round_up(E, 128)
    M_pad = _round_up(M, 128)
    tm_eff = max(8, min(_round_up(tm, 8), _round_up(N, 8)))
    tn_eff = _pick_tile(M_pad, max(tn, 128))      # must divide M_pad exactly

    x2 = jnp.pad(x.reshape(N, E), ((0, 0), (0, E_pad - E)))
    gamma2 = jnp.pad(gamma.reshape(1, E).astype(jnp.float32),
                     ((0, 0), (0, E_pad - E)))
    w1p = jnp.pad(w1, ((0, E_pad - E), (0, M_pad - M))).astype(compute_dtype)
    b1p = jnp.pad(b1.reshape(1, M).astype(jnp.float32),
                  ((0, 0), (0, M_pad - M)))
    w2p = jnp.pad(w2, ((0, M_pad - M), (0, E_pad - E))).astype(compute_dtype)
    b2p = jnp.pad(b2.reshape(1, E).astype(jnp.float32),
                  ((0, 0), (0, E_pad - E)))

    grid_rows = pl.cdiv(N, tm_eff)
    grid = (grid_rows, M_pad // tn_eff)

    # VMEM budget: pipelined operands are double-buffered; scratches once.
    itm_x = jnp.dtype(x.dtype).itemsize
    itm_w = jnp.dtype(compute_dtype).itemsize
    est = 2 * (tm_eff * E_pad * itm_x          # x row tile
               + E_pad * tn_eff * itm_w        # fc1 weight chunk
               + tn_eff * E_pad * itm_w        # fc2 weight chunk
               + tm_eff * E_pad * itm_x)       # output tile
    est += tm_eff * E_pad * (4 + itm_w)        # f32 accumulator + bf16 xn cache
    est += 2 * 4 * (tn_eff + 3 * E_pad)        # biases + gamma (tiny)
    # Default tiles keep this well under 56 MiB, so it also fits v7x's 64 MiB/TC;
    # shrink tn (then tm) before raising the cap if larger tiles are attempted.
    vmem_limit = min(max(est + est // 4 + (2 << 20), 32 << 20), 96 << 20)

    cost = pl.CostEstimate(
        flops=int(4 * N * E_pad * M_pad),                       # two matmuls
        transcendentals=int(N * M_pad),                         # erf per h element
        bytes_accessed=int(
            x2.size * itm_x
            + int(grid_rows) * (w1p.size + w2p.size) * itm_w    # weights re-streamed per row tile
            + (gamma2.size + b1p.size + b2p.size) * 4
            + N * E_pad * itm_x),
    )

    kernel = functools.partial(mlp_block_kernel, eps=eps, true_e=float(E))

    out2 = pl.pallas_call(
        kernel,
        out_shape=jax.ShapeDtypeStruct((N, E_pad), x.dtype),
        grid_spec=pltpu.PrefetchScalarGridSpec(
            num_scalar_prefetch=0,
            grid=grid,
            in_specs=[
                pl.BlockSpec((tm_eff, E_pad), lambda i, j: (i, 0)),   # x rows (reused over j)
                pl.BlockSpec((1, E_pad), lambda i, j: (0, 0)),        # RMSNorm gamma
                pl.BlockSpec((E_pad, tn_eff), lambda i, j: (0, j)),   # fc1 weight chunk
                pl.BlockSpec((1, tn_eff), lambda i, j: (0, j)),       # fc1 bias chunk
                pl.BlockSpec((tn_eff, E_pad), lambda i, j: (j, 0)),   # fc2 weight chunk
                pl.BlockSpec((1, E_pad), lambda i, j: (0, 0)),        # fc2 bias
            ],
            out_specs=pl.BlockSpec((tm_eff, E_pad), lambda i, j: (i, 0)),
            scratch_shapes=[
                pltpu.VMEM((tm_eff, E_pad), jnp.float32),     # fc2 accumulator
                pltpu.VMEM((tm_eff, E_pad), compute_dtype),   # cached RMSNorm(x)
            ],
        ),
        compiler_params=pltpu.CompilerParams(
            dimension_semantics=("parallel", "arbitrary"),
            vmem_limit_bytes=int(vmem_limit),
        ),
        cost_estimate=cost,
    )(x2, gamma2, w1p, b1p, w2p, b2p)

    return out2[:, :E].reshape(B, S, E)


def init_params(key, embedding_dim, mlp_size):
    """Deterministic init mimicking nn.Linear's kaiming-uniform / uniform bias."""
    k1, k2, k3, k4 = jax.random.split(key, 4)
    gamma = jnp.ones((embedding_dim,), jnp.float32)          # RMSNorm weight

    bound1 = 1.0 / math.sqrt(embedding_dim)
    # stored as (in, out) = transpose of PyTorch's (out, in)
    w1 = jax.random.uniform(k1, (embedding_dim, mlp_size), jnp.float32,
                            -bound1, bound1)
    b1 = jax.random.uniform(k2, (mlp_size,), jnp.float32, -bound1, bound1)

    bound2 = 1.0 / math.sqrt(mlp_size)
    w2 = jax.random.uniform(k3, (mlp_size, embedding_dim), jnp.float32,
                            -bound2, bound2)
    b2 = jax.random.uniform(k4, (embedding_dim,), jnp.float32, -bound2, bound2)
    return gamma, w1, b1, w2, b2


def mlp_block_ref(x, gamma, w1, b1, w2, b2, eps=1e-6, compute_dtype=jnp.float32):
    """Pure-JAX reference.  compute_dtype=bf16 mirrors the kernel's MXU numerics."""
    x = x.astype(jnp.float32)
    ms = jnp.mean(x * x, axis=-1, keepdims=True)
    xn = gamma * x * jax.lax.rsqrt(ms + eps)
    h = jnp.dot(xn.astype(compute_dtype), w1.astype(compute_dtype),
                preferred_element_type=jnp.float32) + b1
    h = 0.5 * h * (1.0 + jax.lax.erf(h * (1.0 / math.sqrt(2.0))))
    return jnp.dot(h.astype(compute_dtype), w2.astype(compute_dtype),
                   preferred_element_type=jnp.float32) + b2


if __name__ == "__main__":
    batch, seq, embedding_dim, mlp_size = 2, 8, 32, 64

    key = jax.random.PRNGKey(0)
    kx, kp = jax.random.split(key)
    x = jax.random.normal(kx, (batch, seq, embedding_dim), jnp.float32)
    gamma, w1, b1, w2, b2 = init_params(kp, embedding_dim, mlp_size)

    out = mlp_block(x, gamma, w1, b1, w2, b2)
    out = jax.block_until_ready(out)
    assert out.shape == (batch, seq, embedding_dim)

    # Tight check vs. a reference that mirrors the kernel's bf16-operand /
    # f32-accumulate MXU numerics.
    ref_mxu = mlp_block_ref(x, gamma, w1, b1, w2, b2, compute_dtype=jnp.bfloat16)
    assert jnp.allclose(out, ref_mxu, atol=2e-3, rtol=2e-3), \
        float(jnp.max(jnp.abs(out - ref_mxu)))

    # Looser check vs. pure-f32 PyTorch-module semantics (bf16 MXU operands).
    ref_f32 = mlp_block_ref(x, gamma, w1, b1, w2, b2, compute_dtype=jnp.float32)
    assert jnp.allclose(out, ref_f32, atol=3e-2, rtol=3e-2), \
        float(jnp.max(jnp.abs(out - ref_f32)))

    print("KERNEL_OK")
</pallas_src>

<mosaic_0001>
module attributes {stable_mosaic.version = 11 : i64} {
  func.func @mlp_block_kernel(%arg0: i32, %arg1: i32, %arg2: memref<16x128xf32, #tpu.memory_space<vmem>>, %arg3: memref<1x128xf32, #tpu.memory_space<vmem>>, %arg4: memref<128x128xbf16, #tpu.memory_space<vmem>>, %arg5: memref<1x128xf32, #tpu.memory_space<vmem>>, %arg6: memref<128x128xbf16, #tpu.memory_space<vmem>>, %arg7: memref<1x128xf32, #tpu.memory_space<vmem>>, %arg8: memref<16x128xf32, #tpu.memory_space<vmem>>, %arg9: memref<16x128xf32, #tpu.memory_space<vmem>>, %arg10: memref<16x128xbf16, #tpu.memory_space<vmem>>) attributes {dimension_semantics = [#tpu.dimension_semantics<parallel>, #tpu.dimension_semantics<arbitrary>], iteration_bounds = array<i64: 1, 1>, scalar_prefetch = 0 : i64, scratch_operands = 2 : i64, tpu.core_type = #tpu.core_type<tc>, window_params = [{transform_indices = @transform_0, window_bounds = array<i64: 16, 128>}, {pipeline_mode = #tpu.pipeline_mode<synchronous>, transform_indices = @transform_1, window_bounds = array<i64: 1, 128>}, {transform_indices = @transform_2, window_bounds = array<i64: 128, 128>}, {transform_indices = @transform_3, window_bounds = array<i64: 1, 128>}, {transform_indices = @transform_4, window_bounds = array<i64: 128, 128>}, {pipeline_mode = #tpu.pipeline_mode<synchronous>, transform_indices = @transform_5, window_bounds = array<i64: 1, 128>}, {transform_indices = @transform_6, window_bounds = array<i64: 16, 128>}]} {
    %c0_i32 = arith.constant 0 : i32
    %0 = arith.cmpi eq, %arg1, %c0_i32 : i32
    %1 = arith.extui %0 : i1 to i32
    %c0_i32_0 = arith.constant 0 : i32
    %2 = arith.cmpi ne, %1, %c0_i32_0 : i32
    scf.if %2 {
      %c0_18 = arith.constant 0 : index
      %c0_19 = arith.constant 0 : index
      %26 = vector.load %arg2[%c0_18, %c0_19] : memref<16x128xf32, #tpu.memory_space<vmem>>, vector<16x128xf32>
      %c0_20 = arith.constant 0 : index
      %c0_21 = arith.constant 0 : index
      %27 = vector.load %arg3[%c0_20, %c0_21] : memref<1x128xf32, #tpu.memory_space<vmem>>, vector<1x128xf32>
      %28 = arith.mulf %26, %26 : vector<16x128xf32>
      %cst_22 = arith.constant dense<0.000000e+00> : vector<16xf32>
      %29 = vector.multi_reduction <add>, %28, %cst_22 [1] : vector<16x128xf32> to vector<16xf32>
      %30 = vector.shape_cast %29 : vector<16xf32> to vector<16x1xf32>
      %cst_23 = arith.constant 3.125000e-02 : f32
      %31 = vector.broadcast %cst_23 : f32 to vector<16x1xf32>
      %32 = arith.mulf %30, %31 : vector<16x1xf32>
      %33 = vector.broadcast %27 : vector<1x128xf32> to vector<16x128xf32>
      %34 = arith.mulf %33, %26 : vector<16x128xf32>
      %cst_24 = arith.constant 9.99999997E-7 : f32
      %35 = vector.broadcast %cst_24 : f32 to vector<16x1xf32>
      %36 = arith.addf %32, %35 : vector<16x1xf32>
      %37 = math.rsqrt %36 : vector<16x1xf32>
      %38 = vector.broadcast %37 : vector<16x1xf32> to vector<16x128xf32>
      %39 = arith.mulf %34, %38 : vector<16x128xf32>
      %40 = arith.truncf %39 : vector<16x128xf32> to vector<16x128xbf16>
      %c0_25 = arith.constant 0 : index
      %c0_26 = arith.constant 0 : index
      %41 = vector.load %arg10[%c0_25, %c0_26] : memref<16x128xbf16, #tpu.memory_space<vmem>>, vector<16x128xbf16>
      tpu.vector_store %arg10[%c0_25, %c0_26], %40 {strides = array<i32>} : memref<16x128xbf16, #tpu.memory_space<vmem>>, vector<16x128xbf16>,
      %cst_27 = arith.constant 0.000000e+00 : f32
      %42 = vector.broadcast %cst_27 : f32 to vector<16x128xf32>
      %c0_28 = arith.constant 0 : index
      %c0_29 = arith.constant 0 : index
      %43 = vector.load %arg9[%c0_28, %c0_29] : memref<16x128xf32, #tpu.memory_space<vmem>>, vector<16x128xf32>
      tpu.vector_store %arg9[%c0_28, %c0_29], %42 {strides = array<i32>} : memref<16x128xf32, #tpu.memory_space<vmem>>, vector<16x128xf32>,
    } else {
    }
    %c0 = arith.constant 0 : index
    %c0_1 = arith.constant 0 : index
    %3 = vector.load %arg10[%c0, %c0_1] : memref<16x128xbf16, #tpu.memory_space<vmem>>, vector<16x128xbf16>
    %c0_2 = arith.constant 0 : index
    %c0_3 = arith.constant 0 : index
    %4 = vector.load %arg4[%c0_2, %c0_3] : memref<128x128xbf16, #tpu.memory_space<vmem>>, vector<128x128xbf16>
    %cst = arith.constant dense<0.000000e+00> : vector<16x128xf32>
    %5 = tpu.matmul %3, %4, %cst {dimension_numbers = #tpu.dot_dimension_numbers<[1], [0], [0], [1], [0, 0, 1, 1], [], []>} : vector<16x128xbf16>, vector<128x128xbf16>, vector<16x128xf32> -> vector<16x128xf32>
    %c0_4 = arith.constant 0 : index
    %c0_5 = arith.constant 0 : index
    %6 = vector.load %arg5[%c0_4, %c0_5] : memref<1x128xf32, #tpu.memory_space<vmem>>, vector<1x128xf32>
    %7 = vector.broadcast %6 : vector<1x128xf32> to vector<16x128xf32>
    %8 = arith.addf %5, %7 : vector<16x128xf32>
    %cst_6 = arith.constant 5.000000e-01 : f32
    %9 = vector.broadcast %cst_6 : f32 to vector<16x128xf32>
    %10 = arith.mulf %9, %8 : vector<16x128xf32>
    %cst_7 = arith.constant 0.707106769 : f32
    %11 = vector.broadcast %cst_7 : f32 to vector<16x128xf32>
    %12 = arith.mulf %8, %11 : vector<16x128xf32>
    %13 = math.erf %12 : vector<16x128xf32>
    %cst_8 = arith.constant 1.000000e+00 : f32
    %14 = vector.broadcast %cst_8 : f32 to vector<16x128xf32>
    %15 = arith.addf %14, %13 : vector<16x128xf32>
    %16 = arith.mulf %10, %15 : vector<16x128xf32>
    %c0_9 = arith.constant 0 : index
    %c0_10 = arith.constant 0 : index
    %17 = vector.load %arg9[%c0_9, %c0_10] : memref<16x128xf32, #tpu.memory_space<vmem>>, vector<16x128xf32>
    %18 = arith.truncf %16 : vector<16x128xf32> to vector<16x128xbf16>
    %c0_11 = arith.constant 0 : index
    %c0_12 = arith.constant 0 : index
    %19 = vector.load %arg6[%c0_11, %c0_12] : memref<128x128xbf16, #tpu.memory_space<vmem>>, vector<128x128xbf16>
    %cst_13 = arith.constant dense<0.000000e+00> : vector<16x128xf32>
    %20 = tpu.matmul %18, %19, %cst_13 {dimension_numbers = #tpu.dot_dimension_numbers<[1], [0], [0], [1], [0, 0, 1, 1], [], []>} : vector<16x128xbf16>, vector<128x128xbf16>, vector<16x128xf32> -> vector<16x128xf32>
    %21 = arith.addf %17, %20 : vector<16x128xf32>
    %c0_14 = arith.constant 0 : index
    %c0_15 = arith.constant 0 : index
    %22 = vector.load %arg9[%c0_14, %c0_15] : memref<16x128xf32, #tpu.memory_space<vmem>>, vector<16x128xf32>
    tpu.vector_store %arg9[%c0_14, %c0_15], %21 {strides = array<i32>} : memref<16x128xf32, #tpu.memory_space<vmem>>, vector<16x128xf32>,
    %c0_i32_16 = arith.constant 0 : i32
    %23 = arith.cmpi eq, %arg1, %c0_i32_16 : i32
    %24 = arith.extui %23 : i1 to i32
    %c0_i32_17 = arith.constant 0 : i32
    %25 = arith.cmpi ne, %24, %c0_i32_17 : i32
    scf.if %25 {
      %c0_18 = arith.constant 0 : index
      %c0_19 = arith.constant 0 : index
      %26 = vector.load %arg9[%c0_18, %c0_19] : memref<16x128xf32, #tpu.memory_space<vmem>>, vector<16x128xf32>
      %c0_20 = arith.constant 0 : index
      %c0_21 = arith.constant 0 : index
      %27 = vector.load %arg7[%c0_20, %c0_21] : memref<1x128xf32, #tpu.memory_space<vmem>>, vector<1x128xf32>
      %28 = vector.broadcast %27 : vector<1x128xf32> to vector<16x128xf32>
      %29 = arith.addf %26, %28 : vector<16x128xf32>
      %c0_22 = arith.constant 0 : index
      %c0_23 = arith.constant 0 : index
      %30 = vector.load %arg8[%c0_22, %c0_23] : memref<16x128xf32, #tpu.memory_space<vmem>>, vector<16x128xf32>
      tpu.vector_store %arg8[%c0_22, %c0_23], %29 {strides = array<i32>} : memref<16x128xf32, #tpu.memory_space<vmem>>, vector<16x128xf32>,
    } else {
    }
    return
  }
  func.func @transform_0(%arg0: i32, %arg1: i32) -> (i32, i32) {
    %c0_i32 = arith.constant 0 : i32
    %c0_i32_0 = arith.constant 0 : i32
    return %arg0, %c0_i32 : i32, i32
  }
  func.func @transform_1(%arg0: i32, %arg1: i32) -> (i32, i32) {
    %c0_i32 = arith.constant 0 : i32
    %c0_i32_0 = arith.constant 0 : i32
    %c0_i32_1 = arith.constant 0 : i32
    return %c0_i32, %c0_i32_0 : i32, i32
  }
  func.func @transform_2(%arg0: i32, %arg1: i32) -> (i32, i32) {
    %c0_i32 = arith.constant 0 : i32
    %c0_i32_0 = arith.constant 0 : i32
    return %c0_i32, %arg1 : i32, i32
  }
  func.func @transform_3(%arg0: i32, %arg1: i32) -> (i32, i32) {
    %c0_i32 = arith.constant 0 : i32
    %c0_i32_0 = arith.constant 0 : i32
    return %c0_i32, %arg1 : i32, i32
  }
  func.func @transform_4(%arg0: i32, %arg1: i32) -> (i32, i32) {
    %c0_i32 = arith.constant 0 : i32
    %c0_i32_0 = arith.constant 0 : i32
    return %arg1, %c0_i32 : i32, i32
  }
  func.func @transform_5(%arg0: i32, %arg1: i32) -> (i32, i32) {
    %c0_i32 = arith.constant 0 : i32
    %c0_i32_0 = arith.constant 0 : i32
    %c0_i32_1 = arith.constant 0 : i32
    return %c0_i32, %c0_i32_0 : i32, i32
  }
  func.func @transform_6(%arg0: i32, %arg1: i32) -> (i32, i32) {
    %c0_i32 = arith.constant 0 : i32
    %c0_i32_0 = arith.constant 0 : i32
    return %arg0, %c0_i32 : i32, i32
  }
}

</mosaic_0001>

<bundles_post_ra>
// kernel: tpu_custom_call.1
= control target key start
LH: loop header
LB: loop body
LE: loop exit
PB: predicated region body
PF: predicated region fallthrough
CT: control target
= control target key end

     0   :  { %11 = vsyncpa [#allocation5], 0  ;;  %s681_s0 = inlined_call_operand.hbm [shape: f32[16,128], index: 0, kind: input, shape index: {}]   ;;  %s682_s1 = inlined_call_operand.vmem [shape: f32[1,128], index: 1, kind: input, shape index: {}]   ;;  %s683_s2 = inlined_call_operand.hbm [shape: bf16[128,128], index: 2, kind: input, shape index: {}]   ;;  %s684_s3 = inlined_call_operand.vmem [shape: f32[1,128], index: 3, kind: input, shape index: {}]   ;;  %s685_s4 = inlined_call_operand.hbm [shape: bf16[128,128], index: 4, kind: input, shape index: {}]   ;;  %s686_s5 = inlined_call_operand.vmem [shape: f32[1,128], index: 5, kind: input, shape index: {}]   ;;  %s687_s6 = inlined_call_operand.hbm [shape: f32[16,128], index: 6, kind: output, shape index: {}]  }
   0x1   :  { %12 = vsyncpa [#allocation8], 0 }
   0x2   :  { %13 = vsyncpa [#allocation6], 0  ;;  %s591_s21 = smov [#allocation7]  }
   0x3   :  { %s33_s22 = sshll.u32 %s591_s21, 4  ;;  %s34_s22 = int_to_ptr.vmem [resolvable:$true] %s33_s22 }
   0x4   :  { %s513_s23 = scalar_lea.vmem %s34_s22, 1024  ;;  %p518_p1 = scmp.lt.s32.totalorder %s34_s22, %s34_s22 }
   0x5   :  { %p514_p0 = scmp.ne.s32.totalorder %s34_s22, %s513_s23  ;;  %p519_p2 = scmp.lt.s32.totalorder %s513_s23, %s513_s23 }
   0x7   :  { %p520_p3 = por %p519_p2, %p518_p1 }
   0x9   :  { %p521_p4 = pnand %p520_p3, %p514_p0 }
   0xb   :  { %524 = shalt.err (!%p521_p4)
}
   0xc   :  { %s592_s24 = smov 64   ;;  %s593_s25 = smov 4  }
   0xd   :  { %39 = dma.hbm_to_vmem [thread:$0]  %s683_s2, 1024, %s34_s22, [#allocation8], %s592_s24, %s592_s24, %s593_s25  }
   0xe   :  { %s594_s28 = smov [#allocation4]  }
   0xf   :  { %s19_s29 = sshll.u32 %s594_s28, 4  ;;  %s20_s29 = int_to_ptr.vmem [resolvable:$true] %s19_s29 }
  0x10   :  { %s533_s30 = scalar_lea.vmem %s20_s29, 256  ;;  %p538_p6 = scmp.lt.s32.totalorder %s20_s29, %s20_s29 }
  0x11   :  { %p534_p5 = scmp.ne.s32.totalorder %s20_s29, %s533_s30  ;;  %p539_p7 = scmp.lt.s32.totalorder %s533_s30, %s533_s30 }
  0x13   :  { %p540_p8 = por %p539_p7, %p538_p6 }
  0x15   :  { %p541_p9 = pnand %p540_p8, %p534_p5 }
  0x17   :  { %544 = shalt.err (!%p541_p9)
}
  0x18   :  { %s595_s7 = smov 128   ;;  %s596_s8 = smov 8  }
  0x19   :  { %25 = dma.hbm_to_vmem [thread:$0]  %s681_s0, 256, %s20_s29, [#allocation5], %s595_s7, %s595_s7, %s596_s8  }
  0x1a   :  { %s597_s2 = smov [#allocation9]  }
  0x1b   :  { %s47_s11 = sshll.u32 %s597_s2, 4  ;;  %s48_s11 = int_to_ptr.vmem [resolvable:$true] %s47_s11 }
  0x1c   :  { %s553_s12 = scalar_lea.vmem %s48_s11, 1024  ;;  %p558_p11 = scmp.lt.s32.totalorder %s48_s11, %s48_s11 }
  0x1d   :  { %p554_p10 = scmp.ne.s32.totalorder %s48_s11, %s553_s12  ;;  %p559_p12 = scmp.lt.s32.totalorder %s553_s12, %s553_s12 }
  0x1f   :  { %p560_p13 = por %p559_p12, %p558_p11 }
  0x21   :  { %p561_p0 = pnand %p560_p13, %p554_p10 }
  0x23   :  { %564 = shalt.err (!%p561_p0)
}
  0x24   :  { %53 = dma.hbm_to_vmem [thread:$0]  %s685_s4, 1024, %s48_s11, [#allocation8], %s592_s24, %s592_s24, %s593_s25  }
  0x25   :  { %585 = dma.done.wait [#allocation5], 256  }
  0x26   :  { %586 = vsyncadd [#allocation5], 4294967040 }
  0x27   :  { %587 = dma.done.wait [#allocation8], 2048  }
  0x28   :  { %588 = vsyncadd [#allocation8], 4294965248  ;;  %v70_v0 = vld [vmem:[#allocation4] sm:$0xff]  ;;  %v71_v1 = vld [vmem:[#allocation4 + $0x8] sm:$0xff]  ;;  %v598_v5 = vmov 0.0   ;;  %vm599_vm0 = vmmov 0  }
  0x29   :  { %v73_v2 = vmul.f32 %v70_v0, %v70_v0  ;;  %v74_v3 = vmul.f32 %v71_v1, %v71_v1  ;;  %v480_v4 = vld [vmem:[#allocation7 + $0x38] sm:$0xff]   ;;  %430 = vmatprep.subr.bf16.mxu0 %v598_v5  ;;  %450 = vmatprep.subr.bf16.mxu1 %v598_v5  ;;  %v481_v6 = vld [vmem:[#allocation7 + $0x30] sm:$0xff]   ;;  %v482_v7 = vld [vmem:[#allocation7 + $0x28] sm:$0xff]   ;;  %s600_s17 = smov [#allocation10]  }
  0x2a   :  { %431 = vmatpush3.bf16.msra.mxu0 %v480_v4  ;;  %v483_v8 = vld [vmem:[#allocation7 + $0x20] sm:$0xff]   ;;  %v484_v9 = vld [vmem:[#allocation7 + $0x18] sm:$0xff]   ;;  %v485_v10 = vld [vmem:[#allocation7 + $0x10] sm:$0xff]   ;;  %446 = vmatprep.mubr.msk.bf16.mxu0 %vm599_vm0, %v598_v5  ;;  %s370_s18 = sshll.u32 %s600_s17, 4  ;;  %s371_s18 = int_to_ptr.vmem [resolvable:$true] %s370_s18 }
  0x2b   :  { %75 = vadd.xlane.f32.xlu0 %v73_v2  ;;  %432 = vmatprep.subr.bf16.mxu0 %v598_v5  ;;  %v486_v11 = vld [vmem:[#allocation7 + $0x8] sm:$0xff]   ;;  %v487_v12 = vld [vmem:[#allocation7] sm:$0xff]   ;;  %v489_v13 = vld [vmem:[#allocation9 + $0x38] sm:$0xff]   ;;  %s565_s19 = scalar_lea.vmem %s371_s18, 256  ;;  %p570_p2 = scmp.lt.s32.totalorder %s371_s18, %s371_s18 }
  0x2c   :  { %466 = vmatprep.mubr.msk.bf16.mxu1 %vm599_vm0, %v598_v5  ;;  %451 = vmatpush3.bf16.msra.mxu1 %v489_v13  ;;  %v383_v20 = vld [vmem:[%s682_s1] ss:$0 sm:$0xff]  ;;  %v490_v29 = vld [vmem:[#allocation9 + $0x30] sm:$0xff]   ;;  %v492_v31 = vld [vmem:[#allocation9 + $0x20] sm:$0xff]   ;;  %p566_p1 = scmp.ne.s32.totalorder %s371_s18, %s565_s19  ;;  %p571_p3 = scmp.lt.s32.totalorder %s565_s19, %s565_s19 }
  0x2d   :  { %452 = vmatprep.subr.bf16.mxu1 %v598_v5  ;;  %v87_v21 = vmul.f32 %v383_v20, %v70_v0  ;;  %v88_v22 = vmul.f32 %v383_v20, %v71_v1  ;;  %v491_v30 = vld [vmem:[#allocation9 + $0x28] sm:$0xff]   ;;  %v493_v32 = vld [vmem:[#allocation9 + $0x18] sm:$0xff]   ;;  %v494_v33 = vld [vmem:[#allocation9 + $0x10] sm:$0xff]  }
  0x2e   :  { %433 = vmatpush3.bf16.msra.mxu0 %v481_v6  ;;  %v495_v34 = vld [vmem:[#allocation9 + $0x8] sm:$0xff]   ;;  %v496_v35 = vld [vmem:[#allocation9] sm:$0xff]   ;;  %p572_p4 = por %p571_p3, %p570_p2 }
  0x2f   :  { %77 = vadd.xlane.f32.xlu0 %v74_v3  ;;  %434 = vmatprep.subr.bf16.mxu0 %v598_v5  ;;  %v386_v36 = vld [vmem:[%s684_s3] ss:$0 sm:$0xff] }
  0x30   :  { %453 = vmatpush3.bf16.msra.mxu1 %v490_v29  ;;  %v404_v54 = vld [vmem:[%s686_s5] ss:$0 sm:$0xff]  ;;  %p573_p5 = pnand %p572_p4, %p566_p1 }
  0x31   :  { %454 = vmatprep.subr.bf16.mxu1 %v598_v5 }
  0x32   :  { %435 = vmatpush3.bf16.msra.mxu0 %v482_v7 }
  0x33   :  { %436 = vmatprep.subr.bf16.mxu0 %v598_v5 }
  0x34   :  { %455 = vmatpush3.bf16.msra.mxu1 %v491_v30 }
  0x35   :  { %456 = vmatprep.subr.bf16.mxu1 %v598_v5 }
  0x36   :  { %437 = vmatpush3.bf16.msra.mxu0 %v483_v8 }
  0x37   :  { %438 = vmatprep.subr.bf16.mxu0 %v598_v5 }
  0x38   :  { %457 = vmatpush3.bf16.msra.mxu1 %v492_v31 }
  0x39   :  { %458 = vmatprep.subr.bf16.mxu1 %v598_v5 }
  0x3a   :  { %439 = vmatpush3.bf16.msra.mxu0 %v484_v9 }
  0x3b   :  { %440 = vmatprep.subr.bf16.mxu0 %v598_v5 }
  0x3c   :  { %459 = vmatpush3.bf16.msra.mxu1 %v493_v32 }
  0x3d   :  { %460 = vmatprep.subr.bf16.mxu1 %v598_v5 }
  0x3e   :  { %441 = vmatpush3.bf16.msra.mxu0 %v485_v10 }
  0x3f   :  { %442 = vmatprep.subr.bf16.mxu0 %v598_v5 }
  0x40   :  { %461 = vmatpush3.bf16.msra.mxu1 %v494_v33 }
  0x41   :  { %462 = vmatprep.subr.bf16.mxu1 %v598_v5 }
  0x42   :  { %443 = vmatpush3.bf16.msra.mxu0 %v486_v11 }
  0x43   :  { %444 = vmatprep.subr.bf16.mxu0 %v598_v5 }
  0x44   :  { %463 = vmatpush3.bf16.msra.mxu1 %v495_v34 }
  0x45   :  { %464 = vmatprep.subr.bf16.mxu1 %v598_v5 }
  0x46   :  { %445 = vmatpush3.bf16.msra.mxu0 %v487_v12 }
  0x48   :  { %465 = vmatpush3.bf16.msra.mxu1 %v496_v35 }
  0xb4   :  { %v76_v14 = vpop.xlane.xlu0 %75 }
  0xb5   :  { %v79_v15 = vmul.f32 0.03125, %v76_v14 }
  0xb7   :  { %v89_v16 = vadd.f32 1e-06, %v79_v15 }
  0xb8   :  { %v78_v17 = vpop.xlane.xlu0 %77 }
  0xb9   :  { %v80_v18 = vmul.f32 0.03125, %v78_v17  ;;  %497 = vrsqrt.f32 %v89_v16 }
  0xbb   :  { %v90_v19 = vadd.f32 1e-06, %v80_v18 }
  0xbd   :  { %499 = vrsqrt.f32 %v90_v19 }
  0xc6   :  { %v498_v23 = vpop.eup %497 }
  0xc7   :  { %v93_v25 = vmul.f32 %v498_v23, %v87_v21 }
  0xca   :  { %v500_v24 = vpop.eup %499 }
  0xcb   :  { %v94_v26 = vmul.f32 %v500_v24, %v88_v22 }
  0xcd   :  { %v410_v27 = vpack.c.bf16 %v94_v26, %v93_v25 }
  0xcf   :  { %411 = vst [vmem:[#allocation3] sm:$0xff] %v410_v27  }
  0xd6   :  { %v488_v28 = vld [vmem:[#allocation3] sm:$0xff]  }
  0xd7   :  { %447 = vmatmul.mubr.bf16.vlgmr.msra.gmra.mxu0 %v488_v28 }
 0x197   :  { %v220_v37 = vpop.f32.mrf.mxu0 }
 0x198   :  { %v221_v38 = vadd.f32 %v386_v36, %v220_v37 }
 0x199   :  { %v448_v39 = vpop.f32.mrf.mxu0 }
 0x19a   :  { %v229_v40 = vmul.f32 0.70710677, %v221_v38  ;;  %v227_v48 = vmul.f32 0.5, %v221_v38 }
 0x19b   :  { %v223_v41 = vpop.f32.mrf.mxu0 }
 0x19c   :  { %501 = verf.f32 %v229_v40  ;;  %v224_v42 = vadd.f32 %v386_v36, %v223_v41 }
 0x19d   :  { %v449_v43 = vpop.f32.mrf.mxu0 }
 0x19e   :  { %v230_v44 = vmul.f32 0.70710677, %v224_v42  ;;  %v228_v49 = vmul.f32 0.5, %v224_v42 }
 0x1a0   :  { %503 = verf.f32 %v230_v44 }
 0x1a9   :  { %v502_v45 = vpop.eup %501 }
 0x1aa   :  { %v233_v46 = vadd.f32 1.0, %v502_v45 }
 0x1ac   :  { %v235_v51 = vmul.f32 %v233_v46, %v227_v48 }
 0x1ad   :  { %v504_v47 = vpop.eup %503 }
 0x1ae   :  { %v234_v50 = vadd.f32 1.0, %v504_v47 }
 0x1b0   :  { %v236_v52 = vmul.f32 %v234_v50, %v228_v49 }
 0x1b2   :  { %v239_v53 = vpack.c.bf16 %v236_v52, %v235_v51 }
 0x1b4   :  { %467 = vmatmul.mubr.bf16.vlgmr.msra.gmra.mxu1 %v239_v53 }
 0x274   :  { %v338_v55 = vpop.f32.mrf.mxu1 }
 0x275   :  { %v361_v56 = vadd.f32 %v404_v54, %v338_v55 }
 0x276   :  { %v468_v57 = vpop.f32.mrf.mxu1 }
 0x277   :  { %363 = vst [vmem:[#allocation10] sm:$0xff] %v361_v56 }
 0x278   :  { %v341_v58 = vpop.f32.mrf.mxu1 }
 0x279   :  { %v362_v59 = vadd.f32 %v404_v54, %v341_v58 }
 0x27a   :  { %v469_v60 = vpop.f32.mrf.mxu1 }
 0x27b   :  { %364 = vst [vmem:[#allocation10 + $0x8] sm:$0xff] %v362_v59 }
 0x27c   :  { %576 = shalt.err (!%p573_p5)
}
 0x27d   :  { %376 = dma.vmem_to_hbm [thread:$0]  %s371_s18, 256, %s687_s6, [#allocation6], %s595_s7, %s595_s7, %s596_s8  }
 0x27e   :  { %589 = dma.done.wait [#allocation6], 256  }
 0x27f   :  { %590 = vsyncadd [#allocation6], 4294967040 }
 0x280   :  { %380 = vsyncpa [#allocation5], 1 }
 0x281   :  { %381 = vsyncpa [#allocation8], 1 }
 0x282   :  { %382 = vsyncpa [#allocation6], 1 }

</bundles_post_ra>
